<compile_context>
chip_gen: v7x
topology: tpu7x:2x2x1
jax: 0.10.0
libtpu: 0.0.40
codegen_flags: <defaults>
</compile_context>

<pallas_src>
import functools

import jax
import jax.numpy as jnp
from jax import lax
from jax.experimental import pallas as pl
from jax.experimental.pallas import tpu as pltpu


def _ntxent_kernel(zis_ref, zjs_t_ref, out_ref, pos_ref, s_ref, *,
                   inv_temperature: float, batch: int, tile_m: int,
                   n_tiles: int):
    t = pl.program_id(0)
    inv_temp = jnp.float32(inv_temperature)
    eps2 = jnp.float32(1e-24)          # (F.normalize eps = 1e-12) ** 2

    @pl.when(t == 0)
    def _init():
        pos_ref[...] = jnp.zeros_like(pos_ref)

    # Normalize this zis row tile in f32 (rsqrt -> EUP), cast to the MXU
    # compute dtype (bf16 by default, f32 for tiny temperatures).
    zis = zis_ref[...].astype(jnp.float32)                            # (TM, D)
    inv = lax.rsqrt(jnp.maximum(
        jnp.sum(zis * zis, axis=-1, keepdims=True), eps2))
    zis_n = (zis * inv).astype(zjs_t_ref.dtype)

    # Similarity row block on the MXU: canonical (TM, D) @ (D, B) with f32
    # accumulation; the RHS is pre-normalized and pre-transposed.
    sim_t = lax.dot_general(
        zis_n, zjs_t_ref[...],
        dimension_numbers=(((1,), (0,)), ((), ())),
        preferred_element_type=jnp.float32) * inv_temp                # (TM, B)

    # Diagonal (positives) with one static select; padded rows never exist
    # because tile_m always divides B.
    rows = lax.broadcasted_iota(jnp.int32, (tile_m, batch), 0) + t * tile_m
    cols = lax.broadcasted_iota(jnp.int32, (tile_m, batch), 1)
    masked_diag = jnp.where(rows == cols, sim_t, 0.0)
    diag_col = jnp.sum(masked_diag, axis=1, keepdims=True)            # (TM, 1)
    pos_ref[...] += jnp.sum(masked_diag, axis=0, keepdims=True)       # (1, B)

    # S_i = sum_k exp(sim_t[i,k]) - exp(diag_i)   (no second masked pass).
    s_tile = (jnp.sum(jnp.exp(sim_t), axis=1, keepdims=True)
              - jnp.exp(diag_col))                                    # (TM, 1)
    if n_tiles == 1:
        s_ref[...] = s_tile
    else:
        row0 = pl.multiple_of(t * tile_m, tile_m)
        s_ref[pl.ds(row0, tile_m), :] = s_tile

    @pl.when(t == n_tiles - 1)
    def _finalize():
        # loss[i,j] = log(exp(pos_j) + S_i) - pos_j   (the (B,)+(B,1) quirk),
        # so sum(loss) = sum_i sum_j log(exp(pos_j)+S_i) - B * sum_j pos_j.
        pos_row = pos_ref[...]                                        # (1, B)
        exp_pos = jnp.exp(pos_row)                                    # hoisted
        if n_tiles == 1:
            coupled = jnp.sum(jnp.log(exp_pos + s_ref[...]))
        else:
            # Chunk over row slices so finalize temporaries stay (TM, B)
            # instead of (B, B).
            def body(c, acc):
                off = pl.multiple_of(c * tile_m, tile_m)
                s_chunk = s_ref[pl.ds(off, tile_m), :]                # (TM, 1)
                return acc + jnp.sum(jnp.log(exp_pos + s_chunk))
            coupled = lax.fori_loop(0, n_tiles, body, jnp.float32(0.0))
        out_ref[0, 0] = ((coupled - jnp.float32(batch) * jnp.sum(pos_row))
                         / jnp.float32(batch))


def _vmem_capacity_bytes():
    """Physical VMEM per core; conservative (v7x-sized) fallback."""
    try:
        info = pltpu.get_tpu_info()
        cap = getattr(info, "vmem_capacity_bytes", None)
        if cap:
            return int(cap)
    except Exception:
        pass
    return 64 << 20


def _round_up(x, m):
    return -(-x // m) * m


def _vmem_estimate(tile_m, batch, dim, compute_bytes):
    tm = _round_up(max(tile_m, 8), 8)
    bl = _round_up(max(batch, 128), 128)
    dl = _round_up(max(dim, 128), 128)
    d8 = _round_up(max(dim, 8), 8)
    return (2 * tm * dl * 4                # zis f32 row tile, double-buffered
            + 2 * d8 * bl * compute_bytes  # resident (D, B) RHS (worst case x2)
            + 2 * tm * dl * 4              # zis normalization temporaries
            + 5 * tm * bl * 4              # sim/exp/select + finalize temps
            + 2 * (tm + bl) * 4            # pos / S scratches
            + (2 << 20))                   # compiler-internal slack


def _pick_tile_m(batch, dim, compute_bytes, budget):
    # Only tile sizes that divide B (full tiles everywhere, no padded rows);
    # multiples of 8 for the sublane constraint; B itself is always legal.
    cands = sorted({d for d in range(8, min(batch, 512) + 1, 8)
                    if batch % d == 0} | {batch}, reverse=True)
    for tm in cands:
        if _vmem_estimate(tm, batch, dim, compute_bytes) <= budget:
            return tm
    return cands[-1]


def ntxent_loss_sc(zis, zjs, *, temperature: float, tile_m=None,
                   compute_dtype=None):
    """Pallas TPU implementation of NTXentLossSC.forward (returns a scalar)."""
    B = zis.shape[0]
    zis2 = zis.reshape(B, -1).astype(jnp.float32)
    zjs2 = zjs.reshape(B, -1).astype(jnp.float32)
    D = zis2.shape[1]

    # bf16 keeps the MXU fast; switch to f32 when 1/temperature would amplify
    # the bf16 similarity error too much.
    if compute_dtype is None:
        compute_dtype = jnp.float32 if temperature < 0.05 else jnp.bfloat16
    compute_bytes = jnp.dtype(compute_dtype).itemsize

    # zjs is needed by every row tile: normalize it once here and hand the
    # kernel a (D, B) compute-dtype operand (no f32 copy resident in VMEM, no
    # per-step RHS relayout).
    inv_n = lax.rsqrt(jnp.maximum(
        jnp.sum(zjs2 * zjs2, axis=-1, keepdims=True), 1e-24))
    zjs_nt = (zjs2 * inv_n).T.astype(compute_dtype)                   # (D, B)

    # Generation-aware VMEM budget (v5e/v6e: 128 MiB, v7x: 64 MiB).
    cap = _vmem_capacity_bytes()
    budget = cap - (8 << 20)
    if tile_m is None:
        tile_m = _pick_tile_m(B, D, compute_bytes, budget)
    if B % tile_m != 0 or (tile_m != B and tile_m % 8 != 0):
        tile_m = B                       # single full tile: always legal
    n_tiles = B // tile_m

    est = _vmem_estimate(tile_m, B, D, compute_bytes)
    vmem_limit = int(min(max(est + (4 << 20), 32 << 20), cap - (2 << 20)))

    kernel = functools.partial(
        _ntxent_kernel, inv_temperature=1.0 / temperature, batch=B,
        tile_m=tile_m, n_tiles=n_tiles)

    def call(rhs_spec):
        return pl.pallas_call(
            kernel,
            out_shape=jax.ShapeDtypeStruct((1, 1), jnp.float32),
            grid=(n_tiles,),
            in_specs=[
                pl.BlockSpec((tile_m, D), lambda t: (t, 0)),   # zis row tiles
                rhs_spec,                                      # resident RHS
            ],
            out_specs=pl.BlockSpec(memory_space=pltpu.SMEM),   # scalar result
            scratch_shapes=[
                pltpu.VMEM((1, B), jnp.float32),   # pos_j row accumulator
                pltpu.VMEM((B, 1), jnp.float32),   # S_i per row
            ],
            compiler_params=pltpu.CompilerParams(
                # The single grid axis carries the accumulators + finalize.
                dimension_semantics=("arbitrary",),
                vmem_limit_bytes=vmem_limit,
            ),
        )(zis2, zjs_nt)

    # The RHS block index is constant, so one buffer is enough; fall back to
    # the default double-buffered spec if this build rejects pipeline_mode.
    try:
        out = call(pl.BlockSpec((D, B), lambda t: (0, 0),
                                pipeline_mode=pl.Buffered(1)))
    except Exception:
        out = call(pl.BlockSpec((D, B), lambda t: (0, 0)))
    return out[0, 0]


def _reference_loss(zis, zjs, temperature):
    """Pure-JAX reference mirroring the PyTorch code (incl. broadcasting)."""
    B = zis.shape[0]
    zis = zis.reshape(B, -1).astype(jnp.float32)
    zjs = zjs.reshape(B, -1).astype(jnp.float32)
    zis_n = zis / jnp.maximum(jnp.linalg.norm(zis, axis=-1, keepdims=True), 1e-12)
    zjs_n = zjs / jnp.maximum(jnp.linalg.norm(zjs, axis=-1, keepdims=True), 1e-12)
    sim = zis_n @ zjs_n.T
    pos = jnp.diag(sim) / temperature                      # (B,)
    mask = ~jnp.eye(B, dtype=bool)
    neg = (sim / temperature)[mask].reshape(B, B - 1)      # (B, B-1)
    denom = jnp.exp(pos) + jnp.sum(jnp.exp(neg), axis=-1, keepdims=True)
    loss = -jnp.log(jnp.exp(pos) / denom)                  # (B,)+(B,1)->(B,B)
    return jnp.sum(loss) / B


if __name__ == "__main__":
    key = jax.random.PRNGKey(0)
    k1, k2, k3, k4 = jax.random.split(key, 4)
    temperature = 0.5

    # Case 1: single row tile (B=8), NCHW-style embeddings before flattening.
    zis_a = jax.random.normal(k1, (8, 4, 16, 16), dtype=jnp.float32)
    zjs_a = jax.random.normal(k2, (8, 4, 16, 16), dtype=jnp.float32)
    out_a = ntxent_loss_sc(zis_a, zjs_a, temperature=temperature)
    jax.block_until_ready(out_a)
    ref_a = _reference_loss(zis_a, zjs_a, temperature)
    assert jnp.allclose(out_a, ref_a, rtol=2e-3, atol=2e-3), (out_a, ref_a)

    # Case 2: multi-tile path (B=16 with forced tile_m=8 -> 2 row tiles),
    # exercising the accumulators and the chunked finalize.
    zis_b = jax.random.normal(k3, (16, 4, 8, 8), dtype=jnp.float32)
    zjs_b = jax.random.normal(k4, (16, 4, 8, 8), dtype=jnp.float32)
    out_b = ntxent_loss_sc(zis_b, zjs_b, temperature=temperature, tile_m=8)
    jax.block_until_ready(out_b)
    ref_b = _reference_loss(zis_b, zjs_b, temperature)
    assert jnp.allclose(out_b, ref_b, rtol=2e-3, atol=2e-3), (out_b, ref_b)

    print("KERNEL_OK")
</pallas_src>

<mosaic_0001>
module attributes {stable_mosaic.version = 11 : i64} {
  func.func @_ntxent_kernel(%arg0: i32, %arg1: memref<8x1024xf32, #tpu.memory_space<vmem>>, %arg2: memref<1024x8xbf16, #tpu.memory_space<vmem>>, %arg3: memref<1x1xf32, #tpu.memory_space<smem>>, %arg4: memref<1x8xf32, #tpu.memory_space<vmem>>, %arg5: memref<8x1xf32, #tpu.memory_space<vmem>>) attributes {dimension_semantics = [#tpu.dimension_semantics<arbitrary>], iteration_bounds = array<i64: 1>, scalar_prefetch = 0 : i64, scratch_operands = 2 : i64, tpu.core_type = #tpu.core_type<tc>, window_params = [{transform_indices = @transform_0, window_bounds = array<i64: 8, 1024>}, {pipeline_mode = #tpu.pipeline_mode<synchronous>, transform_indices = @transform_1, window_bounds = array<i64: 1024, 8>}, {transform_indices = @transform_2, window_bounds = array<i64: 1, 1>}]} {
    %c0_i32 = arith.constant 0 : i32
    %0 = arith.cmpi eq, %arg0, %c0_i32 : i32
    %1 = arith.extui %0 : i1 to i32
    %c0_i32_0 = arith.constant 0 : i32
    %2 = arith.cmpi ne, %1, %c0_i32_0 : i32
    scf.if %2 {
      %cst_19 = arith.constant 0.000000e+00 : f32
      %41 = vector.broadcast %cst_19 : f32 to vector<1x8xf32>
      %c0_20 = arith.constant 0 : index
      %c0_21 = arith.constant 0 : index
      %42 = vector.load %arg4[%c0_20, %c0_21] : memref<1x8xf32, #tpu.memory_space<vmem>>, vector<1x8xf32>
      tpu.vector_store %arg4[%c0_20, %c0_21], %41 {strides = array<i32>} : memref<1x8xf32, #tpu.memory_space<vmem>>, vector<1x8xf32>,
    } else {
    }
    %c0 = arith.constant 0 : index
    %c0_1 = arith.constant 0 : index
    %3 = vector.load %arg1[%c0, %c0_1] : memref<8x1024xf32, #tpu.memory_space<vmem>>, vector<8x1024xf32>
    %4 = arith.mulf %3, %3 : vector<8x1024xf32>
    %cst = arith.constant dense<0.000000e+00> : vector<8xf32>
    %5 = vector.multi_reduction <add>, %4, %cst [1] : vector<8x1024xf32> to vector<8xf32>
    %6 = vector.shape_cast %5 : vector<8xf32> to vector<8x1xf32>
    %cst_2 = arith.constant 1.000000e-24 : f32
    %7 = vector.broadcast %cst_2 : f32 to vector<8x1xf32>
    %8 = arith.maximumf %6, %7 : vector<8x1xf32>
    %9 = math.rsqrt %8 : vector<8x1xf32>
    %10 = vector.broadcast %9 : vector<8x1xf32> to vector<8x1024xf32>
    %11 = arith.mulf %3, %10 : vector<8x1024xf32>
    %12 = arith.truncf %11 : vector<8x1024xf32> to vector<8x1024xbf16>
    %c0_3 = arith.constant 0 : index
    %c0_4 = arith.constant 0 : index
    %13 = vector.load %arg2[%c0_3, %c0_4] : memref<1024x8xbf16, #tpu.memory_space<vmem>>, vector<1024x8xbf16>
    %cst_5 = arith.constant dense<0.000000e+00> : vector<8x8xf32>
    %14 = tpu.matmul %12, %13, %cst_5 {dimension_numbers = #tpu.dot_dimension_numbers<[1], [0], [0], [1], [0, 0, 1, 1], [], []>} : vector<8x1024xbf16>, vector<1024x8xbf16>, vector<8x8xf32> -> vector<8x8xf32>
    %cst_6 = arith.constant 2.000000e+00 : f32
    %15 = vector.broadcast %cst_6 : f32 to vector<8x8xf32>
    %16 = arith.mulf %14, %15 : vector<8x8xf32>
    %17 = tpu.iota {dimensions = array<i32: 0>} : vector<8x8xi32>
    %c8_i32 = arith.constant 8 : i32
    %18 = arith.muli %arg0, %c8_i32 : i32
    %19 = vector.broadcast %18 : i32 to vector<8x8xi32>
    %20 = arith.addi %17, %19 : vector<8x8xi32>
    %21 = tpu.iota {dimensions = array<i32: 1>} : vector<8x8xi32>
    %22 = arith.cmpi eq, %20, %21 : vector<8x8xi32>
    %cst_7 = arith.constant 0.000000e+00 : f32
    %23 = vector.broadcast %cst_7 : f32 to vector<8x8xf32>
    %24 = arith.select %22, %16, %23 : vector<8x8xi1>, vector<8x8xf32>
    %cst_8 = arith.constant dense<0.000000e+00> : vector<8xf32>
    %25 = vector.multi_reduction <add>, %24, %cst_8 [1] : vector<8x8xf32> to vector<8xf32>
    %26 = vector.shape_cast %25 : vector<8xf32> to vector<8x1xf32>
    %c0_9 = arith.constant 0 : index
    %c0_10 = arith.constant 0 : index
    %27 = vector.load %arg4[%c0_9, %c0_10] : memref<1x8xf32, #tpu.memory_space<vmem>>, vector<1x8xf32>
    %cst_11 = arith.constant dense<0.000000e+00> : vector<8xf32>
    %28 = vector.multi_reduction <add>, %24, %cst_11 [0] : vector<8x8xf32> to vector<8xf32>
    %29 = vector.shape_cast %28 : vector<8xf32> to vector<1x8xf32>
    %30 = arith.addf %27, %29 : vector<1x8xf32>
    %c0_12 = arith.constant 0 : index
    %c0_13 = arith.constant 0 : index
    %31 = vector.load %arg4[%c0_12, %c0_13] : memref<1x8xf32, #tpu.memory_space<vmem>>, vector<1x8xf32>
    tpu.vector_store %arg4[%c0_12, %c0_13], %30 {strides = array<i32>} : memref<1x8xf32, #tpu.memory_space<vmem>>, vector<1x8xf32>,
    %32 = math.exp %16 : vector<8x8xf32>
    %cst_14 = arith.constant dense<0.000000e+00> : vector<8xf32>
    %33 = vector.multi_reduction <add>, %32, %cst_14 [1] : vector<8x8xf32> to vector<8xf32>
    %34 = vector.shape_cast %33 : vector<8xf32> to vector<8x1xf32>
    %35 = math.exp %26 : vector<8x1xf32>
    %36 = arith.subf %34, %35 : vector<8x1xf32>
    %c0_15 = arith.constant 0 : index
    %c0_16 = arith.constant 0 : index
    %37 = vector.load %arg5[%c0_15, %c0_16] : memref<8x1xf32, #tpu.memory_space<vmem>>, vector<8x1xf32>
    tpu.vector_store %arg5[%c0_15, %c0_16], %36 {strides = array<i32>} : memref<8x1xf32, #tpu.memory_space<vmem>>, vector<8x1xf32>,
    %c0_i32_17 = arith.constant 0 : i32
    %38 = arith.cmpi eq, %arg0, %c0_i32_17 : i32
    %39 = arith.extui %38 : i1 to i32
    %c0_i32_18 = arith.constant 0 : i32
    %40 = arith.cmpi ne, %39, %c0_i32_18 : i32
    scf.if %40 {
      %c0_19 = arith.constant 0 : index
      %c0_20 = arith.constant 0 : index
      %41 = vector.load %arg4[%c0_19, %c0_20] : memref<1x8xf32, #tpu.memory_space<vmem>>, vector<1x8xf32>
      %42 = math.exp %41 : vector<1x8xf32>
      %c0_21 = arith.constant 0 : index
      %c0_22 = arith.constant 0 : index
      %43 = vector.load %arg5[%c0_21, %c0_22] : memref<8x1xf32, #tpu.memory_space<vmem>>, vector<8x1xf32>
      %44 = vector.broadcast %42 : vector<1x8xf32> to vector<8x8xf32>
      %45 = vector.broadcast %43 : vector<8x1xf32> to vector<8x8xf32>
      %46 = arith.addf %44, %45 : vector<8x8xf32>
      %47 = math.log %46 : vector<8x8xf32>
      %48 = vector.shape_cast %47 : vector<8x8xf32> to vector<1x8x8xf32>
      %cst_23 = arith.constant dense<0.000000e+00> : vector<1xf32>
      %49 = vector.multi_reduction <add>, %48, %cst_23 [1, 2] : vector<1x8x8xf32> to vector<1xf32>
      %50 = vector.shape_cast %49 : vector<1xf32> to vector<1x1x1xf32>
      %51 = vector.extract %50[0, 0, 0] : f32 from vector<1x1x1xf32>
      %52 = vector.shape_cast %41 : vector<1x8xf32> to vector<1x1x8xf32>
      %cst_24 = arith.constant dense<0.000000e+00> : vector<1xf32>
      %53 = vector.multi_reduction <add>, %52, %cst_24 [1, 2] : vector<1x1x8xf32> to vector<1xf32>
      %54 = vector.shape_cast %53 : vector<1xf32> to vector<1x1x1xf32>
      %55 = vector.extract %54[0, 0, 0] : f32 from vector<1x1x1xf32>
      %cst_25 = arith.constant 8.000000e+00 : f32
      %56 = arith.mulf %cst_25, %55 : f32
      %57 = arith.subf %51, %56 : f32
      %cst_26 = arith.constant 8.000000e+00 : f32
      %58 = arith.divf %57, %cst_26 : f32
      %c0_27 = arith.constant 0 : index
      %c0_28 = arith.constant 0 : index
      %59 = memref.load %arg3[%c0_27, %c0_28] : memref<1x1xf32, #tpu.memory_space<smem>>
      memref.store %58, %arg3[%c0_27, %c0_28] : memref<1x1xf32, #tpu.memory_space<smem>>
    } else {
    }
    return
  }
  func.func @transform_0(%arg0: i32) -> (i32, i32) {
    %c0_i32 = arith.constant 0 : i32
    %c0_i32_0 = arith.constant 0 : i32
    return %arg0, %c0_i32 : i32, i32
  }
  func.func @transform_1(%arg0: i32) -> (i32, i32) {
    %c0_i32 = arith.constant 0 : i32
    %c0_i32_0 = arith.constant 0 : i32
    %c0_i32_1 = arith.constant 0 : i32
    return %c0_i32, %c0_i32_0 : i32, i32
  }
  func.func @transform_2(%arg0: i32) -> (i32, i32) {
    %c0_i32 = arith.constant 0 : i32
    %c0_i32_0 = arith.constant 0 : i32
    %c0_i32_1 = arith.constant 0 : i32
    return %c0_i32, %c0_i32_0 : i32, i32
  }
}

module attributes {stable_mosaic.version = 11 : i64} {
  func.func @_ntxent_kernel(%arg0: i32, %arg1: memref<8x1024xf32, #tpu.memory_space<vmem>>, %arg2: memref<1024x8xbf16, #tpu.memory_space<vmem>>, %arg3: memref<1x1xf32, #tpu.memory_space<smem>>, %arg4: memref<1x8xf32, #tpu.memory_space<vmem>>, %arg5: memref<8x1xf32, #tpu.memory_space<vmem>>) attributes {dimension_semantics = [#tpu.dimension_semantics<arbitrary>], iteration_bounds = array<i64: 1>, scalar_prefetch = 0 : i64, scratch_operands = 2 : i64, tpu.core_type = #tpu.core_type<tc>, window_params = [{transform_indices = @transform_0, window_bounds = array<i64: 8, 1024>}, {pipeline_mode = #tpu.pipeline_mode<synchronous>, transform_indices = @transform_1, window_bounds = array<i64: 1024, 8>}, {transform_indices = @transform_2, window_bounds = array<i64: 1, 1>}]} {
    %c0_i32 = arith.constant 0 : i32
    %0 = arith.cmpi eq, %arg0, %c0_i32 : i32
    %1 = arith.extui %0 : i1 to i32
    %c0_i32_0 = arith.constant 0 : i32
    %2 = arith.cmpi ne, %1, %c0_i32_0 : i32
    scf.if %2 {
      %cst_19 = arith.constant 0.000000e+00 : f32
      %41 = vector.broadcast %cst_19 : f32 to vector<1x8xf32>
      %c0_20 = arith.constant 0 : index
      %c0_21 = arith.constant 0 : index
      %42 = vector.load %arg4[%c0_20, %c0_21] : memref<1x8xf32, #tpu.memory_space<vmem>>, vector<1x8xf32>
      tpu.vector_store %arg4[%c0_20, %c0_21], %41 {strides = array<i32>} : memref<1x8xf32, #tpu.memory_space<vmem>>, vector<1x8xf32>,
    } else {
    }
    %c0 = arith.constant 0 : index
    %c0_1 = arith.constant 0 : index
    %3 = vector.load %arg1[%c0, %c0_1] : memref<8x1024xf32, #tpu.memory_space<vmem>>, vector<8x1024xf32>
    %4 = arith.mulf %3, %3 : vector<8x1024xf32>
    %cst = arith.constant dense<0.000000e+00> : vector<8xf32>
    %5 = vector.multi_reduction <add>, %4, %cst [1] : vector<8x1024xf32> to vector<8xf32>
    %6 = vector.shape_cast %5 : vector<8xf32> to vector<8x1xf32>
    %cst_2 = arith.constant 1.000000e-24 : f32
    %7 = vector.broadcast %cst_2 : f32 to vector<8x1xf32>
    %8 = arith.maximumf %6, %7 : vector<8x1xf32>
    %9 = math.rsqrt %8 : vector<8x1xf32>
    %10 = vector.broadcast %9 : vector<8x1xf32> to vector<8x1024xf32>
    %11 = arith.mulf %3, %10 : vector<8x1024xf32>
    %12 = arith.truncf %11 : vector<8x1024xf32> to vector<8x1024xbf16>
    %c0_3 = arith.constant 0 : index
    %c0_4 = arith.constant 0 : index
    %13 = vector.load %arg2[%c0_3, %c0_4] : memref<1024x8xbf16, #tpu.memory_space<vmem>>, vector<1024x8xbf16>
    %cst_5 = arith.constant dense<0.000000e+00> : vector<8x8xf32>
    %14 = tpu.matmul %12, %13, %cst_5 {dimension_numbers = #tpu.dot_dimension_numbers<[1], [0], [0], [1], [0, 0, 1, 1], [], []>} : vector<8x1024xbf16>, vector<1024x8xbf16>, vector<8x8xf32> -> vector<8x8xf32>
    %cst_6 = arith.constant 2.000000e+00 : f32
    %15 = vector.broadcast %cst_6 : f32 to vector<8x8xf32>
    %16 = arith.mulf %14, %15 : vector<8x8xf32>
    %17 = tpu.iota {dimensions = array<i32: 0>} : vector<8x8xi32>
    %c8_i32 = arith.constant 8 : i32
    %18 = arith.muli %arg0, %c8_i32 : i32
    %19 = vector.broadcast %18 : i32 to vector<8x8xi32>
    %20 = arith.addi %17, %19 : vector<8x8xi32>
    %21 = tpu.iota {dimensions = array<i32: 1>} : vector<8x8xi32>
    %22 = arith.cmpi eq, %20, %21 : vector<8x8xi32>
    %cst_7 = arith.constant 0.000000e+00 : f32
    %23 = vector.broadcast %cst_7 : f32 to vector<8x8xf32>
    %24 = arith.select %22, %16, %23 : vector<8x8xi1>, vector<8x8xf32>
    %cst_8 = arith.constant dense<0.000000e+00> : vector<8xf32>
    %25 = vector.multi_reduction <add>, %24, %cst_8 [1] : vector<8x8xf32> to vector<8xf32>
    %26 = vector.shape_cast %25 : vector<8xf32> to vector<8x1xf32>
    %c0_9 = arith.constant 0 : index
    %c0_10 = arith.constant 0 : index
    %27 = vector.load %arg4[%c0_9, %c0_10] : memref<1x8xf32, #tpu.memory_space<vmem>>, vector<1x8xf32>
    %cst_11 = arith.constant dense<0.000000e+00> : vector<8xf32>
    %28 = vector.multi_reduction <add>, %24, %cst_11 [0] : vector<8x8xf32> to vector<8xf32>
    %29 = vector.shape_cast %28 : vector<8xf32> to vector<1x8xf32>
    %30 = arith.addf %27, %29 : vector<1x8xf32>
    %c0_12 = arith.constant 0 : index
    %c0_13 = arith.constant 0 : index
    %31 = vector.load %arg4[%c0_12, %c0_13] : memref<1x8xf32, #tpu.memory_space<vmem>>, vector<1x8xf32>
    tpu.vector_store %arg4[%c0_12, %c0_13], %30 {strides = array<i32>} : memref<1x8xf32, #tpu.memory_space<vmem>>, vector<1x8xf32>,
    %32 = math.exp %16 : vector<8x8xf32>
    %cst_14 = arith.constant dense<0.000000e+00> : vector<8xf32>
    %33 = vector.multi_reduction <add>, %32, %cst_14 [1] : vector<8x8xf32> to vector<8xf32>
    %34 = vector.shape_cast %33 : vector<8xf32> to vector<8x1xf32>
    %35 = math.exp %26 : vector<8x1xf32>
    %36 = arith.subf %34, %35 : vector<8x1xf32>
    %c0_15 = arith.constant 0 : index
    %c0_16 = arith.constant 0 : index
    %37 = vector.load %arg5[%c0_15, %c0_16] : memref<8x1xf32, #tpu.memory_space<vmem>>, vector<8x1xf32>
    tpu.vector_store %arg5[%c0_15, %c0_16], %36 {strides = array<i32>} : memref<8x1xf32, #tpu.memory_space<vmem>>, vector<8x1xf32>,
    %c0_i32_17 = arith.constant 0 : i32
    %38 = arith.cmpi eq, %arg0, %c0_i32_17 : i32
    %39 = arith.extui %38 : i1 to i32
    %c0_i32_18 = arith.constant 0 : i32
    %40 = arith.cmpi ne, %39, %c0_i32_18 : i32
    scf.if %40 {
      %c0_19 = arith.constant 0 : index
      %c0_20 = arith.constant 0 : index
      %41 = vector.load %arg4[%c0_19, %c0_20] : memref<1x8xf32, #tpu.memory_space<vmem>>, vector<1x8xf32>
      %42 = math.exp %41 : vector<1x8xf32>
      %c0_21 = arith.constant 0 : index
      %c0_22 = arith.constant 0 : index
      %43 = vector.load %arg5[%c0_21, %c0_22] : memref<8x1xf32, #tpu.memory_space<vmem>>, vector<8x1xf32>
      %44 = vector.broadcast %42 : vector<1x8xf32> to vector<8x8xf32>
      %45 = vector.broadcast %43 : vector<8x1xf32> to vector<8x8xf32>
      %46 = arith.addf %44, %45 : vector<8x8xf32>
      %47 = math.log %46 : vector<8x8xf32>
      %48 = vector.shape_cast %47 : vector<8x8xf32> to vector<1x8x8xf32>
      %cst_23 = arith.constant dense<0.000000e+00> : vector<1xf32>
      %49 = vector.multi_reduction <add>, %48, %cst_23 [1, 2] : vector<1x8x8xf32> to vector<1xf32>
      %50 = vector.shape_cast %49 : vector<1xf32> to vector<1x1x1xf32>
      %51 = vector.extract %50[0, 0, 0] : f32 from vector<1x1x1xf32>
      %52 = vector.shape_cast %41 : vector<1x8xf32> to vector<1x1x8xf32>
      %cst_24 = arith.constant dense<0.000000e+00> : vector<1xf32>
      %53 = vector.multi_reduction <add>, %52, %cst_24 [1, 2] : vector<1x1x8xf32> to vector<1xf32>
      %54 = vector.shape_cast %53 : vector<1xf32> to vector<1x1x1xf32>
      %55 = vector.extract %54[0, 0, 0] : f32 from vector<1x1x1xf32>
      %cst_25 = arith.constant 8.000000e+00 : f32
      %56 = arith.mulf %cst_25, %55 : f32
      %57 = arith.subf %51, %56 : f32
      %cst_26 = arith.constant 8.000000e+00 : f32
      %58 = arith.divf %57, %cst_26 : f32
      %c0_27 = arith.constant 0 : index
      %c0_28 = arith.constant 0 : index
      %59 = memref.load %arg3[%c0_27, %c0_28] : memref<1x1xf32, #tpu.memory_space<smem>>
      memref.store %58, %arg3[%c0_27, %c0_28] : memref<1x1xf32, #tpu.memory_space<smem>>
    } else {
    }
    return
  }
  func.func @transform_0(%arg0: i32) -> (i32, i32) {
    %c0_i32 = arith.constant 0 : i32
    %c0_i32_0 = arith.constant 0 : i32
    return %arg0, %c0_i32 : i32, i32
  }
  func.func @transform_1(%arg0: i32) -> (i32, i32) {
    %c0_i32 = arith.constant 0 : i32
    %c0_i32_0 = arith.constant 0 : i32
    %c0_i32_1 = arith.constant 0 : i32
    return %c0_i32, %c0_i32_0 : i32, i32
  }
  func.func @transform_2(%arg0: i32) -> (i32, i32) {
    %c0_i32 = arith.constant 0 : i32
    %c0_i32_0 = arith.constant 0 : i32
    %c0_i32_1 = arith.constant 0 : i32
    return %c0_i32, %c0_i32_0 : i32, i32
  }
}

</mosaic_0001>

<bundles_post_ra>
// kernel: tpu_custom_call.1
= control target key start
LH: loop header
LB: loop body
LE: loop exit
PB: predicated region body
PF: predicated region fallthrough
CT: control target
= control target key end

     0   :  { %s1378_s0 = inlined_call_operand.vmem [shape: f32[8,1024], index: 0, kind: input, shape index: {}]   ;;  %s1379_s1 = inlined_call_operand.vmem [shape: bf16[1024,8], index: 1, kind: input, shape index: {}]   ;;  %s1380_s2 = inlined_call_operand.hbm [shape: f32[1,1], index: 2, kind: output, shape index: {}]  }
   0x1   :  { %v1097_v0 = vld [vmem:[%s1378_s0] sm:$0xff]  ;;  %v1102_v1 = vld [vmem:[%s1378_s0 + $0x8] sm:$0xff]  ;;  %v1107_v2 = vld [vmem:[%s1378_s0 + $0x10] sm:$0xff] }
   0x2   :  { %v1112_v3 = vld [vmem:[%s1378_s0 + $0x18] sm:$0xff]  ;;  %v27_v4 = vmul.f32 %v1097_v0, %v1097_v0  ;;  %v28_v5 = vmul.f32 %v1102_v1, %v1102_v1  ;;  %v29_v6 = vmul.f32 %v1107_v2, %v1107_v2  ;;  %v1123_v7 = vld [vmem:[%s1378_s0 + $0x20] sm:$0xff]  ;;  %v1128_v8 = vld [vmem:[%s1378_s0 + $0x28] sm:$0xff] }
   0x3   :  { %v30_v9 = vmul.f32 %v1112_v3, %v1112_v3  ;;  %v990_v11 = vld [vmem:[%s1379_s1 + $0x40] sm:$0xff]   ;;  %v1138_v12 = vld [vmem:[%s1378_s0 + $0x30] sm:$0xff]  ;;  %v31_v14 = vmul.f32 %v1123_v7, %v1123_v7  ;;  %v1151_v17 = vld [vmem:[%s1378_s0 + $0x38] sm:$0xff]  ;;  %v32_v19 = vmul.f32 %v1128_v8, %v1128_v8 }
   0x4   :  { %v35_v10 = vadd.f32 %v28_v5, %v27_v4  ;;  %v991_v13 = vld [vmem:[%s1379_s1 + $0xc0] sm:$0xff]   ;;  %893 = vmatprep.subr.bf16.mxu0 %v990_v11  ;;  %v994_v21 = vld [vmem:[%s1379_s1 + $0x48] sm:$0xff]   ;;  %v33_v23 = vmul.f32 %v1138_v12, %v1138_v12  ;;  %v34_v27 = vmul.f32 %v1151_v17, %v1151_v17  ;;  %v998_v29 = vld [vmem:[%s1379_s1 + $0x50] sm:$0xff]  }
   0x5   :  { %v992_v16 = vld [vmem:[%s1379_s1] sm:$0xff]   ;;  %915 = vmatprep.subr.bf16.mxu1 %v991_v13  ;;  %v995_v22 = vld [vmem:[%s1379_s1 + $0xc8] sm:$0xff]   ;;  %v999_v30 = vld [vmem:[%s1379_s1 + $0xd0] sm:$0xff]  }
   0x6   :  { %v36_v15 = vadd.f32 %v35_v10, %v29_v6  ;;  %v993_v18 = vld [vmem:[%s1379_s1 + $0x80] sm:$0xff]   ;;  %894 = vmatpush3.bf16.msra.mxu0 %v992_v16  ;;  %v996_v25 = vld [vmem:[%s1379_s1 + $0x8] sm:$0xff]   ;;  %v1000_v32 = vld [vmem:[%s1379_s1 + $0x10] sm:$0xff]  }
   0x7   :  { %916 = vmatpush3.bf16.msra.mxu1 %v993_v18  ;;  %895 = vmatprep.subr.bf16.mxu0 %v994_v21  ;;  %v997_v26 = vld [vmem:[%s1379_s1 + $0x88] sm:$0xff]   ;;  %v1001_v33 = vld [vmem:[%s1379_s1 + $0x90] sm:$0xff]   ;;  %v1002_v35 = vld [vmem:[%s1379_s1 + $0x58] sm:$0xff]  }
   0x8   :  { %v37_v20 = vadd.f32 %v36_v15, %v30_v9  ;;  %917 = vmatprep.subr.bf16.mxu1 %v995_v22  ;;  %v1003_v36 = vld [vmem:[%s1379_s1 + $0xd8] sm:$0xff]   ;;  %v1006_v39 = vld [vmem:[%s1379_s1 + $0x60] sm:$0xff]   ;;  %v1010_v43 = vld [vmem:[%s1379_s1 + $0x68] sm:$0xff]  }
   0x9   :  { %v1004_v37 = vld [vmem:[%s1379_s1 + $0x18] sm:$0xff]   ;;  %v1007_v40 = vld [vmem:[%s1379_s1 + $0xe0] sm:$0xff]   ;;  %v1011_v44 = vld [vmem:[%s1379_s1 + $0xe8] sm:$0xff]  }
   0xa   :  { %v38_v24 = vadd.f32 %v37_v20, %v31_v14  ;;  %896 = vmatpush3.bf16.msra.mxu0 %v996_v25  ;;  %v1005_v38 = vld [vmem:[%s1379_s1 + $0x98] sm:$0xff]   ;;  %v1008_v41 = vld [vmem:[%s1379_s1 + $0x20] sm:$0xff]   ;;  %v1012_v45 = vld [vmem:[%s1379_s1 + $0x28] sm:$0xff]  }
   0xb   :  { %918 = vmatpush3.bf16.msra.mxu1 %v997_v26  ;;  %897 = vmatprep.subr.bf16.mxu0 %v998_v29  ;;  %v1009_v42 = vld [vmem:[%s1379_s1 + $0xa0] sm:$0xff]   ;;  %v1013_v46 = vld [vmem:[%s1379_s1 + $0xa8] sm:$0xff]   ;;  %v1014_v47 = vld [vmem:[%s1379_s1 + $0x70] sm:$0xff]  }
   0xc   :  { %v39_v28 = vadd.f32 %v38_v24, %v32_v19  ;;  %919 = vmatprep.subr.bf16.mxu1 %v999_v30  ;;  %v1015_v48 = vld [vmem:[%s1379_s1 + $0xf0] sm:$0xff]   ;;  %v1018_v51 = vld [vmem:[%s1379_s1 + $0x78] sm:$0xff]   ;;  %v1022_v55 = vld [vmem:[%s1379_s1 + $0x140] sm:$0xff]  }
   0xd   :  { %v1016_v49 = vld [vmem:[%s1379_s1 + $0x30] sm:$0xff]   ;;  %v1019_v52 = vld [vmem:[%s1379_s1 + $0xf8] sm:$0xff]   ;;  %v1023_v56 = vld [vmem:[%s1379_s1 + $0x1c0] sm:$0xff]  }
   0xe   :  { %v40_v31 = vadd.f32 %v39_v28, %v33_v23  ;;  %898 = vmatpush3.bf16.msra.mxu0 %v1000_v32  ;;  %v1017_v50 = vld [vmem:[%s1379_s1 + $0xb0] sm:$0xff]   ;;  %v1020_v53 = vld [vmem:[%s1379_s1 + $0x38] sm:$0xff]  }
   0xf   :  { %920 = vmatpush3.bf16.msra.mxu1 %v1001_v33  ;;  %899 = vmatprep.subr.bf16.mxu0 %v1002_v35  ;;  %v1021_v54 = vld [vmem:[%s1379_s1 + $0xb8] sm:$0xff]  }
  0x10   :  { %v41_v34 = vadd.f32 %v40_v31, %v34_v27  ;;  %921 = vmatprep.subr.bf16.mxu1 %v1003_v36 }
  0x12   :  { %42 = vadd.xlane.f32.xlu0 %v41_v34  ;;  %900 = vmatpush3.bf16.msra.mxu0 %v1004_v37 }
  0x13   :  { %922 = vmatpush3.bf16.msra.mxu1 %v1005_v38  ;;  %901 = vmatprep.subr.bf16.mxu0 %v1006_v39 }
  0x14   :  { %923 = vmatprep.subr.bf16.mxu1 %v1007_v40 }
  0x16   :  { %902 = vmatpush3.bf16.msra.mxu0 %v1008_v41 }
  0x17   :  { %924 = vmatpush3.bf16.msra.mxu1 %v1009_v42  ;;  %903 = vmatprep.subr.bf16.mxu0 %v1010_v43 }
  0x18   :  { %925 = vmatprep.subr.bf16.mxu1 %v1011_v44 }
  0x1a   :  { %904 = vmatpush3.bf16.msra.mxu0 %v1012_v45 }
  0x1b   :  { %926 = vmatpush3.bf16.msra.mxu1 %v1013_v46  ;;  %905 = vmatprep.subr.bf16.mxu0 %v1014_v47 }
  0x1c   :  { %927 = vmatprep.subr.bf16.mxu1 %v1015_v48 }
  0x1e   :  { %906 = vmatpush3.bf16.msra.mxu0 %v1016_v49 }
  0x1f   :  { %928 = vmatpush3.bf16.msra.mxu1 %v1017_v50  ;;  %907 = vmatprep.subr.bf16.mxu0 %v1018_v51 }
  0x20   :  { %929 = vmatprep.subr.bf16.mxu1 %v1019_v52 }
  0x22   :  { %908 = vmatpush3.bf16.msra.mxu0 %v1020_v53 }
  0x23   :  { %930 = vmatpush3.bf16.msra.mxu1 %v1021_v54  ;;  %937 = vmatprep.subr.bf16.mxu0 %v1022_v55 }
  0x24   :  { %959 = vmatprep.subr.bf16.mxu1 %v1023_v56 }
  0x25   :  { %7 = vsyncpa [#allocation5], 0  ;;  %v1028_v14 = vld [vmem:[%s1379_s1 + $0x108] sm:$0xff]   ;;  %v1030_v16 = vld [vmem:[%s1379_s1 + $0x150] sm:$0xff]   ;;  %vm17_vm0 = vcmask 57344   ;;  %v1076_v44 = vmov 0.0   ;;  %v735_v54 = vlaneseq }
  0x26   :  { %v1029_v15 = vld [vmem:[%s1379_s1 + $0x188] sm:$0xff]   ;;  %v1032_v18 = vld [vmem:[%s1379_s1 + $0x110] sm:$0xff]   ;;  %v1034_v20 = vld [vmem:[%s1379_s1 + $0x158] sm:$0xff]   ;;  %18 = vst.msk [vmem:[#allocation2] sm:$0x1] %vm17_vm0, %v1076_v44  ;;  %vm744_vm2 = vcmask 64512  }
  0x27   :  { %v1033_v19 = vld [vmem:[%s1379_s1 + $0x190] sm:$0xff]   ;;  %v1035_v21 = vld [vmem:[%s1379_s1 + $0x1d8] sm:$0xff]   ;;  %v1038_v24 = vld [vmem:[%s1379_s1 + $0x160] sm:$0xff]   ;;  %vm766_vm3 = vcmask 7168   ;;  %s1064_s14 = scalar_lea.hbm %s1380_s2, 16 }
  0x28   :  { %v1036_v22 = vld [vmem:[%s1379_s1 + $0x118] sm:$0xff]   ;;  %v1039_v25 = vld [vmem:[%s1379_s1 + $0x1e0] sm:$0xff]   ;;  %v1042_v28 = vld [vmem:[%s1379_s1 + $0x168] sm:$0xff]   ;;  %p1065_p0 = scmp.ne.s32.totalorder %s1380_s2, %s1064_s14  ;;  %p1068_p1 = scmp.lt.u32.totalorder %s1064_s14, %s1380_s2 }
  0x29   :  { %v1037_v23 = vld [vmem:[%s1379_s1 + $0x198] sm:$0xff]   ;;  %v1040_v26 = vld [vmem:[%s1379_s1 + $0x120] sm:$0xff]   ;;  %v1043_v29 = vld [vmem:[%s1379_s1 + $0x1e8] sm:$0xff]  }
  0x2a   :  { %v1041_v27 = vld [vmem:[%s1379_s1 + $0x1a0] sm:$0xff]   ;;  %v1044_v30 = vld [vmem:[%s1379_s1 + $0x128] sm:$0xff]   ;;  %v1046_v32 = vld [vmem:[%s1379_s1 + $0x170] sm:$0xff]   ;;  %p1070_p2 = pnand %p1068_p1, %p1065_p0 }
  0x2b   :  { %v1045_v31 = vld [vmem:[%s1379_s1 + $0x1a8] sm:$0xff]   ;;  %v1047_v33 = vld [vmem:[%s1379_s1 + $0x1f0] sm:$0xff]   ;;  %v1050_v36 = vld [vmem:[%s1379_s1 + $0x178] sm:$0xff]  }
  0x2c   :  { %v1048_v34 = vld [vmem:[%s1379_s1 + $0x130] sm:$0xff]   ;;  %v1051_v37 = vld [vmem:[%s1379_s1 + $0x1f8] sm:$0xff]  }
  0x2d   :  { %v1049_v35 = vld [vmem:[%s1379_s1 + $0x1b0] sm:$0xff]   ;;  %v1052_v38 = vld [vmem:[%s1379_s1 + $0x138] sm:$0xff]  }
  0x2e   :  { %v1053_v39 = vld [vmem:[%s1379_s1 + $0x1b8] sm:$0xff]  }
  0x9f   :  { %v43_v57 = vpop.xlane.xlu0 %42 }
  0xa0   :  { %v44_v58 = vmax.f32 %v43_v57, 1e-24 }
  0xa2   :  { %1054 = vrsqrt.f32 %v44_v58 }
  0xac   :  { %v1252_v59 = vpop.eup %1054 }
  0xad   :  { %v47_v60 = vmul.f32 %v1252_v59, %v1102_v1  ;;  %v49_v61 = vmul.f32 %v1252_v59, %v1112_v3  ;;  %v46_v62 = vmul.f32 %v1252_v59, %v1097_v0  ;;  %v48_v63 = vmul.f32 %v1252_v59, %v1107_v2  ;;  %v1024_v1 = vld [vmem:[%s1379_s1 + $0x100] sm:$0xff]   ;;  %v1026_v2 = vld [vmem:[%s1379_s1 + $0x148] sm:$0xff]  }
  0xae   :  { %v51_v4 = vmul.f32 %v1252_v59, %v1128_v8  ;;  %v53_v5 = vmul.f32 %v1252_v59, %v1151_v17  ;;  %v1025_v0 = vld [vmem:[%s1379_s1 + $0x180] sm:$0xff]   ;;  %v1027_v3 = vld [vmem:[%s1379_s1 + $0x1c8] sm:$0xff]   ;;  %v1031_v17 = vld [vmem:[%s1379_s1 + $0x1d0] sm:$0xff]   ;;  %v50_v40 = vmul.f32 %v1252_v59, %v1123_v7  ;;  %v52_v41 = vmul.f32 %v1252_v59, %v1138_v12 }
  0xaf   :  { %v55_v6 = vpack.c.bf16 %v47_v60, %v47_v60  ;;  %v57_v9 = vpack.c.bf16 %v49_v61, %v49_v61  ;;  %v54_v10 = vpack.c.bf16 %v46_v62, %v46_v62  ;;  %v56_v11 = vpack.c.bf16 %v48_v63, %v48_v63 }
  0xb0   :  { %v59_v8 = vpack.c.bf16 %v51_v4, %v51_v4  ;;  %v61_v13 = vpack.c.bf16 %v53_v5, %v53_v5  ;;  %v58_v42 = vpack.c.bf16 %v50_v40, %v50_v40  ;;  %v60_v43 = vpack.c.bf16 %v52_v41, %v52_v41 }
  0xb1   :  { %606 = vmatprep.mubr.bf16.mxu0 %v55_v6  ;;  %646 = vmatprep.mubr.bf16.mxu1 %v57_v9  ;;  %v736_v5 = vshrl.u32 %v735_v54, 7  ;;  %v741_v6 = vand.u32 127, %v735_v54 }
  0xb2   :  { %607 = vmatmul.mubr.bf16.vlgmr.msra.gmra.mrb[0].mxu0 %v54_v10  ;;  %647 = vmatmul.mubr.bf16.vlgmr.msra.gmra.mrb[0].mxu1 %v56_v11 }
  0xb3   :  { %938 = vmatpush3.bf16.msra.mxu0 %v1024_v1  ;;  %960 = vmatpush3.bf16.msra.mxu1 %v1025_v0  ;;  %vm742_vm1 = vcmp.eq.s32.totalorder %v736_v5, %v741_v6 }
  0xb4   :  { %686 = vmatprep.mubr.bf16.mxu0 %v59_v8  ;;  %726 = vmatprep.mubr.bf16.mxu1 %v61_v13 }
  0xb5   :  { %939 = vmatprep.subr.bf16.mxu0 %v1026_v2  ;;  %961 = vmatprep.subr.bf16.mxu1 %v1027_v3 }
  0xb7   :  { %940 = vmatpush3.bf16.msra.mxu0 %v1028_v14  ;;  %962 = vmatpush3.bf16.msra.mxu1 %v1029_v15 }
  0xb8   :  { %941 = vmatprep.subr.bf16.mxu0 %v1030_v16  ;;  %963 = vmatprep.subr.bf16.mxu1 %v1031_v17  ;;  %v748_v16 = vld [vmem:[#allocation2] sm:$0x1] }
  0xbb   :  { %942 = vmatpush3.bf16.msra.mxu0 %v1032_v18  ;;  %964 = vmatpush3.bf16.msra.mxu1 %v1033_v19 }
  0xbc   :  { %943 = vmatprep.subr.bf16.mxu0 %v1034_v20  ;;  %965 = vmatprep.subr.bf16.mxu1 %v1035_v21  ;;  %v1077_v21 = vmov 0  }
  0xbd   :  { %988 = vset.pattern.permute.xlu1 %v1077_v21  ;;  %989 = vset.pattern.permute.xlu0 %v1077_v21 }
  0xbf   :  { %944 = vmatpush3.bf16.msra.mxu0 %v1036_v22  ;;  %966 = vmatpush3.bf16.msra.mxu1 %v1037_v23 }
  0xc0   :  { %945 = vmatprep.subr.bf16.mxu0 %v1038_v24  ;;  %967 = vmatprep.subr.bf16.mxu1 %v1039_v25 }
  0xc3   :  { %946 = vmatpush3.bf16.msra.mxu0 %v1040_v26  ;;  %968 = vmatpush3.bf16.msra.mxu1 %v1041_v27 }
  0xc4   :  { %947 = vmatprep.subr.bf16.mxu0 %v1042_v28  ;;  %969 = vmatprep.subr.bf16.mxu1 %v1043_v29 }
  0xc7   :  { %948 = vmatpush3.bf16.msra.mxu0 %v1044_v30  ;;  %970 = vmatpush3.bf16.msra.mxu1 %v1045_v31  ;;  %v778_v30 = vsub.s32 0, %v736_v5 }
  0xc8   :  { %949 = vmatprep.subr.bf16.mxu0 %v1046_v32  ;;  %971 = vmatprep.subr.bf16.mxu1 %v1047_v33 }
  0xcb   :  { %950 = vmatpush3.bf16.msra.mxu0 %v1048_v34  ;;  %972 = vmatpush3.bf16.msra.mxu1 %v1049_v35 }
  0xcc   :  { %951 = vmatprep.subr.bf16.mxu0 %v1050_v36  ;;  %973 = vmatprep.subr.bf16.mxu1 %v1051_v37 }
  0xcf   :  { %952 = vmatpush3.bf16.msra.mxu0 %v1052_v38  ;;  %974 = vmatpush3.bf16.msra.mxu1 %v1053_v39 }
  0xd2   :  { %687 = vmatmul.mubr.bf16.vlgmr.msra.gmra.mrb[4].mxu0 %v58_v42  ;;  %727 = vmatmul.mubr.bf16.vlgmr.msra.gmra.mrb[4].mxu1 %v60_v43 }
 0x185   :  { %v909_v45 = vpop.f32.mrb[0].mxu0  ;;  %v931_v46 = vpop.f32.mrb[0].mxu1 }
 0x186   :  { %v910_v47 = vpop.f32.mrb[1].mxu0  ;;  %v932_v48 = vpop.f32.mrb[1].mxu1 }
 0x187   :  { %v911_v49 = vadd.f32 %v910_v47, %v909_v45  ;;  %v933_v50 = vadd.f32 %v932_v48, %v931_v46  ;;  %v912_v7 = vpop.f32.mrb[2].mxu0  ;;  %v934_v51 = vpop.f32.mrb[2].mxu1 }
 0x188   :  { %v913_v52 = vpop.f32.mrb[3].mxu0  ;;  %v935_v12 = vpop.f32.mrb[3].mxu1 }
 0x189   :  { %v649_v53 = vadd.f32 %v933_v50, %v911_v49 }
 0x1a5   :  { %v953_v55 = vpop.f32.mrb[4].mxu0  ;;  %v975_v56 = vpop.f32.mrb[4].mxu1 }
 0x1a6   :  { %v954_v57 = vpop.f32.mrb[5].mxu0  ;;  %v976_v58 = vpop.f32.mrb[5].mxu1 }
 0x1a7   :  { %v955_v59 = vadd.f32 %v954_v57, %v953_v55  ;;  %v977_v60 = vadd.f32 %v976_v58, %v975_v56  ;;  %v956_v61 = vpop.f32.mrb[6].mxu0  ;;  %v978_v62 = vpop.f32.mrb[6].mxu1 }
 0x1a8   :  { %v957_v63 = vpop.f32.mrb[7].mxu0  ;;  %v979_v4 = vpop.f32.mrb[7].mxu1 }
 0x1a9   :  { %v689_v9 = vadd.f32 %v955_v59, %v649_v53 }
 0x1ab   :  { %v729_v10 = vadd.f32 %v977_v60, %v689_v9 }
 0x1ad   :  { %v734_v11 = vmul.f32 2.0, %v729_v10 }
 0x1af   :  { %v758_v1 = vmul.f32 1.442695, %v734_v11  ;;  %v743_v0 = vsel %vm742_vm1, %v734_v11, 0.0 }
 0x1b0   :  { %v745_v2 = vsel %vm744_vm2, %v743_v0, 0.0 }
 0x1b1   :  { %1056 = vpow2.f32 %v758_v1  ;;  %746 = vadd.xlane.f32.xlu0 %v745_v2  ;;  %v749_v3 = vrot.slane %v745_v2, 4 }
 0x1b3   :  { %v750_v8 = vadd.f32 %v749_v3, %v745_v2 }
 0x1b5   :  { %v751_v13 = vrot.slane %v750_v8, 2 }
 0x1b7   :  { %v752_v14 = vadd.f32 %v751_v13, %v750_v8 }
 0x1b9   :  { %v753_v15 = vrot.slane %v752_v14, 1 }
 0x1bb   :  { %v1057_v17 = vpop.eup %1056  ;;  %v754_v18 = vadd.f32 %v753_v15, %v752_v14 }
 0x1bc   :  { %v760_v19 = vsel %vm744_vm2, %v1057_v17, 0.0 }
 0x1bd   :  { %v755_v20 = vadd.f32 %v754_v18, %v748_v16  ;;  %761 = vadd.xlane.f32.xlu1 %v760_v19 }
 0x1bf   :  { %757 = vst.msk [vmem:[#allocation2] sm:$0x1] %vm17_vm0, %v755_v20 }
 0x1c6   :  { %v771_v28 = vld [vmem:[#allocation2] sm:$0x1] }
 0x1c7   :  { %v772_v29 = vmul.f32 1.442695, %v771_v28  ;;  %v799_v38 = vsel %vm17_vm0, %v771_v28, 0.0 }
 0x23e   :  { %v747_v22 = vpop.xlane.xlu0 %746 }
 0x23f   :  { %v763_v23 = vmul.f32 1.442695, %v747_v22 }
 0x241   :  { %1058 = vpow2.f32 %v763_v23 }
 0x242   :  { %1060 = vpow2.f32 %v772_v29 }
 0x24a   :  { %v762_v24 = vpop.xlane.xlu1 %761 }
 0x24b   :  { %v1059_v25 = vpop.eup %1058 }
 0x24c   :  { %v765_v26 = vsub.f32 %v762_v24, %v1059_v25  ;;  %v1061_v31 = vpop.eup %1060 }
 0x24d   :  { %v779_v32 = vrot.slane %v1061_v31, %v778_v30 }
 0x24e   :  { %767 = vst.msk [vmem:[#allocation3] sm:$0xff] %vm766_vm3, %v765_v26 }
 0x255   :  { %v774_v27 = vld [vmem:[#allocation3] sm:$0xff] }
 0x256   :  { %783 = vperm.xlu1 %988, %v774_v27  }
 0x2d5   :  { %v784_v33 = vpop.permute.xlu1 %783 }
 0x2d6   :  { %v786_v34 = vadd.f32 %v784_v33, %v779_v32 }
 0x2d8   :  { %1062 = vlog2.f32 %v786_v34 }
 0x2e2   :  { %v1063_v35 = vpop.eup %1062 }
 0x2e3   :  { %v788_v36 = vmul.f32 0.6931472, %v1063_v35 }
 0x2e5   :  { %v789_v37 = vsel %vm744_vm2, %v788_v36, 0.0 }
 0x2e6   :  { %790 = vadd.xlane.f32.xlu0 %v789_v37 }
 0x2ea   :  { %800 = vadd.xlane.f32.xlu0 %v799_v38 }
 0x373   :  { %v791_v39 = vpop.xlane.xlu0 %790 }
 0x374   :  { %v792_v40 = vrot.slane %v791_v39, 4 }
 0x376   :  { %v793_v41 = vadd.f32 %v792_v40, %v791_v39 }
 0x377   :  { %v801_v42 = vpop.xlane.xlu0 %800 }
 0x378   :  { %v794_v43 = vrot.slane %v793_v41, 2  ;;  %v802_v44 = vrot.slane %v801_v42, 4 }
 0x37a   :  { %v803_v45 = vadd.f32 %v802_v44, %v801_v42  ;;  %v795_v46 = vadd.f32 %v794_v43, %v793_v41 }
 0x37c   :  { %v804_v47 = vrot.slane %v803_v45, 2  ;;  %v796_v48 = vrot.slane %v795_v46, 1 }
 0x37e   :  { %v805_v49 = vadd.f32 %v804_v47, %v803_v45  ;;  %v797_v50 = vadd.f32 %v796_v48, %v795_v46 }
 0x380   :  { %981 = vpush %v797_v50  ;;  %v806_v7 = vrot.slane %v805_v49, 1 }
 0x382   :  { %v807_v51 = vadd.f32 %v806_v7, %v805_v49 }
 0x384   :  { %983 = vpush %v807_v51 }
 0x3b1   :  { %s982_s1 = spop %981 }
 0x3b5   :  { %s984_s0 = spop %983 }
 0x3b6   :  { %s809_s9 = smul.f32 8.0, %s984_s0 }
 0x3b8   :  { %s810_s10 = ssub.f32 %s982_s1, %s809_s9 }
 0x3ba   :  { %s813_s11 = smul.f32 0.125, %s810_s10 }
 0x3bc   :  { %815 = sst [smem:[#allocation4]] %s813_s11 }
 0x3bd   :  { %1073 = shalt.err (!%p1070_p2)
}
 0x3be   :  { %s1078_s19 = smov [#allocation4]  }
 0x3bf   :  { %823 = dma.smem_to_hbm %s1078_s19, 16, %s1380_s2, [#allocation5]  }
 0x3c0   :  { %1074 = dma.done.wait [#allocation5], 16  }
 0x3c1   :  { %1075 = vsyncadd [#allocation5], 4294967280 }
 0x3c2   :  { %827 = sfence }
 0x3c3   :  { %828 = vsyncpa [#allocation5], 1 }

// kernel: tpu_custom_call.1
= control target key start
LH: loop header
LB: loop body
LE: loop exit
PB: predicated region body
PF: predicated region fallthrough
CT: control target
= control target key end

     0   :  { %s1378_s0 = inlined_call_operand.vmem [shape: f32[8,1024], index: 0, kind: input, shape index: {}]   ;;  %s1379_s1 = inlined_call_operand.vmem [shape: bf16[1024,8], index: 1, kind: input, shape index: {}]   ;;  %s1380_s2 = inlined_call_operand.hbm [shape: f32[1,1], index: 2, kind: output, shape index: {}]  }
   0x1   :  { %v1097_v0 = vld [vmem:[%s1378_s0] sm:$0xff]  ;;  %v1102_v1 = vld [vmem:[%s1378_s0 + $0x8] sm:$0xff]  ;;  %v1107_v2 = vld [vmem:[%s1378_s0 + $0x10] sm:$0xff] }
   0x2   :  { %v1112_v3 = vld [vmem:[%s1378_s0 + $0x18] sm:$0xff]  ;;  %v27_v4 = vmul.f32 %v1097_v0, %v1097_v0  ;;  %v28_v5 = vmul.f32 %v1102_v1, %v1102_v1  ;;  %v29_v6 = vmul.f32 %v1107_v2, %v1107_v2  ;;  %v1123_v7 = vld [vmem:[%s1378_s0 + $0x20] sm:$0xff]  ;;  %v1128_v8 = vld [vmem:[%s1378_s0 + $0x28] sm:$0xff] }
   0x3   :  { %v30_v9 = vmul.f32 %v1112_v3, %v1112_v3  ;;  %v990_v11 = vld [vmem:[%s1379_s1 + $0x40] sm:$0xff]   ;;  %v1138_v12 = vld [vmem:[%s1378_s0 + $0x30] sm:$0xff]  ;;  %v31_v14 = vmul.f32 %v1123_v7, %v1123_v7  ;;  %v1151_v17 = vld [vmem:[%s1378_s0 + $0x38] sm:$0xff]  ;;  %v32_v19 = vmul.f32 %v1128_v8, %v1128_v8 }
   0x4   :  { %v35_v10 = vadd.f32 %v28_v5, %v27_v4  ;;  %v991_v13 = vld [vmem:[%s1379_s1 + $0xc0] sm:$0xff]   ;;  %893 = vmatprep.subr.bf16.mxu0 %v990_v11  ;;  %v994_v21 = vld [vmem:[%s1379_s1 + $0x48] sm:$0xff]   ;;  %v33_v23 = vmul.f32 %v1138_v12, %v1138_v12  ;;  %v34_v27 = vmul.f32 %v1151_v17, %v1151_v17  ;;  %v998_v29 = vld [vmem:[%s1379_s1 + $0x50] sm:$0xff]  }
   0x5   :  { %v992_v16 = vld [vmem:[%s1379_s1] sm:$0xff]   ;;  %915 = vmatprep.subr.bf16.mxu1 %v991_v13  ;;  %v995_v22 = vld [vmem:[%s1379_s1 + $0xc8] sm:$0xff]   ;;  %v999_v30 = vld [vmem:[%s1379_s1 + $0xd0] sm:$0xff]  }
   0x6   :  { %v36_v15 = vadd.f32 %v35_v10, %v29_v6  ;;  %v993_v18 = vld [vmem:[%s1379_s1 + $0x80] sm:$0xff]   ;;  %894 = vmatpush3.bf16.msra.mxu0 %v992_v16  ;;  %v996_v25 = vld [vmem:[%s1379_s1 + $0x8] sm:$0xff]   ;;  %v1000_v32 = vld [vmem:[%s1379_s1 + $0x10] sm:$0xff]  }
   0x7   :  { %916 = vmatpush3.bf16.msra.mxu1 %v993_v18  ;;  %895 = vmatprep.subr.bf16.mxu0 %v994_v21  ;;  %v997_v26 = vld [vmem:[%s1379_s1 + $0x88] sm:$0xff]   ;;  %v1001_v33 = vld [vmem:[%s1379_s1 + $0x90] sm:$0xff]   ;;  %v1002_v35 = vld [vmem:[%s1379_s1 + $0x58] sm:$0xff]  }
   0x8   :  { %v37_v20 = vadd.f32 %v36_v15, %v30_v9  ;;  %917 = vmatprep.subr.bf16.mxu1 %v995_v22  ;;  %v1003_v36 = vld [vmem:[%s1379_s1 + $0xd8] sm:$0xff]   ;;  %v1006_v39 = vld [vmem:[%s1379_s1 + $0x60] sm:$0xff]   ;;  %v1010_v43 = vld [vmem:[%s1379_s1 + $0x68] sm:$0xff]  }
   0x9   :  { %v1004_v37 = vld [vmem:[%s1379_s1 + $0x18] sm:$0xff]   ;;  %v1007_v40 = vld [vmem:[%s1379_s1 + $0xe0] sm:$0xff]   ;;  %v1011_v44 = vld [vmem:[%s1379_s1 + $0xe8] sm:$0xff]  }
   0xa   :  { %v38_v24 = vadd.f32 %v37_v20, %v31_v14  ;;  %896 = vmatpush3.bf16.msra.mxu0 %v996_v25  ;;  %v1005_v38 = vld [vmem:[%s1379_s1 + $0x98] sm:$0xff]   ;;  %v1008_v41 = vld [vmem:[%s1379_s1 + $0x20] sm:$0xff]   ;;  %v1012_v45 = vld [vmem:[%s1379_s1 + $0x28] sm:$0xff]  }
   0xb   :  { %918 = vmatpush3.bf16.msra.mxu1 %v997_v26  ;;  %897 = vmatprep.subr.bf16.mxu0 %v998_v29  ;;  %v1009_v42 = vld [vmem:[%s1379_s1 + $0xa0] sm:$0xff]   ;;  %v1013_v46 = vld [vmem:[%s1379_s1 + $0xa8] sm:$0xff]   ;;  %v1014_v47 = vld [vmem:[%s1379_s1 + $0x70] sm:$0xff]  }
   0xc   :  { %v39_v28 = vadd.f32 %v38_v24, %v32_v19  ;;  %919 = vmatprep.subr.bf16.mxu1 %v999_v30  ;;  %v1015_v48 = vld [vmem:[%s1379_s1 + $0xf0] sm:$0xff]   ;;  %v1018_v51 = vld [vmem:[%s1379_s1 + $0x78] sm:$0xff]   ;;  %v1022_v55 = vld [vmem:[%s1379_s1 + $0x140] sm:$0xff]  }
   0xd   :  { %v1016_v49 = vld [vmem:[%s1379_s1 + $0x30] sm:$0xff]   ;;  %v1019_v52 = vld [vmem:[%s1379_s1 + $0xf8] sm:$0xff]   ;;  %v1023_v56 = vld [vmem:[%s1379_s1 + $0x1c0] sm:$0xff]  }
   0xe   :  { %v40_v31 = vadd.f32 %v39_v28, %v33_v23  ;;  %898 = vmatpush3.bf16.msra.mxu0 %v1000_v32  ;;  %v1017_v50 = vld [vmem:[%s1379_s1 + $0xb0] sm:$0xff]   ;;  %v1020_v53 = vld [vmem:[%s1379_s1 + $0x38] sm:$0xff]  }
   0xf   :  { %920 = vmatpush3.bf16.msra.mxu1 %v1001_v33  ;;  %899 = vmatprep.subr.bf16.mxu0 %v1002_v35  ;;  %v1021_v54 = vld [vmem:[%s1379_s1 + $0xb8] sm:$0xff]  }
  0x10   :  { %v41_v34 = vadd.f32 %v40_v31, %v34_v27  ;;  %921 = vmatprep.subr.bf16.mxu1 %v1003_v36 }
  0x12   :  { %42 = vadd.xlane.f32.xlu0 %v41_v34  ;;  %900 = vmatpush3.bf16.msra.mxu0 %v1004_v37 }
  0x13   :  { %922 = vmatpush3.bf16.msra.mxu1 %v1005_v38  ;;  %901 = vmatprep.subr.bf16.mxu0 %v1006_v39 }
  0x14   :  { %923 = vmatprep.subr.bf16.mxu1 %v1007_v40 }
  0x16   :  { %902 = vmatpush3.bf16.msra.mxu0 %v1008_v41 }
  0x17   :  { %924 = vmatpush3.bf16.msra.mxu1 %v1009_v42  ;;  %903 = vmatprep.subr.bf16.mxu0 %v1010_v43 }
  0x18   :  { %925 = vmatprep.subr.bf16.mxu1 %v1011_v44 }
  0x1a   :  { %904 = vmatpush3.bf16.msra.mxu0 %v1012_v45 }
  0x1b   :  { %926 = vmatpush3.bf16.msra.mxu1 %v1013_v46  ;;  %905 = vmatprep.subr.bf16.mxu0 %v1014_v47 }
  0x1c   :  { %927 = vmatprep.subr.bf16.mxu1 %v1015_v48 }
  0x1e   :  { %906 = vmatpush3.bf16.msra.mxu0 %v1016_v49 }
  0x1f   :  { %928 = vmatpush3.bf16.msra.mxu1 %v1017_v50  ;;  %907 = vmatprep.subr.bf16.mxu0 %v1018_v51 }
  0x20   :  { %929 = vmatprep.subr.bf16.mxu1 %v1019_v52 }
  0x22   :  { %908 = vmatpush3.bf16.msra.mxu0 %v1020_v53 }
  0x23   :  { %930 = vmatpush3.bf16.msra.mxu1 %v1021_v54  ;;  %937 = vmatprep.subr.bf16.mxu0 %v1022_v55 }
  0x24   :  { %959 = vmatprep.subr.bf16.mxu1 %v1023_v56 }
  0x25   :  { %7 = vsyncpa [#allocation5], 0  ;;  %v1028_v14 = vld [vmem:[%s1379_s1 + $0x108] sm:$0xff]   ;;  %v1030_v16 = vld [vmem:[%s1379_s1 + $0x150] sm:$0xff]   ;;  %vm17_vm0 = vcmask 57344   ;;  %v1076_v44 = vmov 0.0   ;;  %v735_v54 = vlaneseq }
  0x26   :  { %v1029_v15 = vld [vmem:[%s1379_s1 + $0x188] sm:$0xff]   ;;  %v1032_v18 = vld [vmem:[%s1379_s1 + $0x110] sm:$0xff]   ;;  %v1034_v20 = vld [vmem:[%s1379_s1 + $0x158] sm:$0xff]   ;;  %18 = vst.msk [vmem:[#allocation2] sm:$0x1] %vm17_vm0, %v1076_v44  ;;  %vm744_vm2 = vcmask 64512  }
  0x27   :  { %v1033_v19 = vld [vmem:[%s1379_s1 + $0x190] sm:$0xff]   ;;  %v1035_v21 = vld [vmem:[%s1379_s1 + $0x1d8] sm:$0xff]   ;;  %v1038_v24 = vld [vmem:[%s1379_s1 + $0x160] sm:$0xff]   ;;  %vm766_vm3 = vcmask 7168   ;;  %s1064_s14 = scalar_lea.hbm %s1380_s2, 16 }
  0x28   :  { %v1036_v22 = vld [vmem:[%s1379_s1 + $0x118] sm:$0xff]   ;;  %v1039_v25 = vld [vmem:[%s1379_s1 + $0x1e0] sm:$0xff]   ;;  %v1042_v28 = vld [vmem:[%s1379_s1 + $0x168] sm:$0xff]   ;;  %p1065_p0 = scmp.ne.s32.totalorder %s1380_s2, %s1064_s14  ;;  %p1068_p1 = scmp.lt.u32.totalorder %s1064_s14, %s1380_s2 }
  0x29   :  { %v1037_v23 = vld [vmem:[%s1379_s1 + $0x198] sm:$0xff]   ;;  %v1040_v26 = vld [vmem:[%s1379_s1 + $0x120] sm:$0xff]   ;;  %v1043_v29 = vld [vmem:[%s1379_s1 + $0x1e8] sm:$0xff]  }
  0x2a   :  { %v1041_v27 = vld [vmem:[%s1379_s1 + $0x1a0] sm:$0xff]   ;;  %v1044_v30 = vld [vmem:[%s1379_s1 + $0x128] sm:$0xff]   ;;  %v1046_v32 = vld [vmem:[%s1379_s1 + $0x170] sm:$0xff]   ;;  %p1070_p2 = pnand %p1068_p1, %p1065_p0 }
  0x2b   :  { %v1045_v31 = vld [vmem:[%s1379_s1 + $0x1a8] sm:$0xff]   ;;  %v1047_v33 = vld [vmem:[%s1379_s1 + $0x1f0] sm:$0xff]   ;;  %v1050_v36 = vld [vmem:[%s1379_s1 + $0x178] sm:$0xff]  }
  0x2c   :  { %v1048_v34 = vld [vmem:[%s1379_s1 + $0x130] sm:$0xff]   ;;  %v1051_v37 = vld [vmem:[%s1379_s1 + $0x1f8] sm:$0xff]  }
  0x2d   :  { %v1049_v35 = vld [vmem:[%s1379_s1 + $0x1b0] sm:$0xff]   ;;  %v1052_v38 = vld [vmem:[%s1379_s1 + $0x138] sm:$0xff]  }
  0x2e   :  { %v1053_v39 = vld [vmem:[%s1379_s1 + $0x1b8] sm:$0xff]  }
  0x9f   :  { %v43_v57 = vpop.xlane.xlu0 %42 }
  0xa0   :  { %v44_v58 = vmax.f32 %v43_v57, 1e-24 }
  0xa2   :  { %1054 = vrsqrt.f32 %v44_v58 }
  0xac   :  { %v1252_v59 = vpop.eup %1054 }
  0xad   :  { %v47_v60 = vmul.f32 %v1252_v59, %v1102_v1  ;;  %v49_v61 = vmul.f32 %v1252_v59, %v1112_v3  ;;  %v46_v62 = vmul.f32 %v1252_v59, %v1097_v0  ;;  %v48_v63 = vmul.f32 %v1252_v59, %v1107_v2  ;;  %v1024_v1 = vld [vmem:[%s1379_s1 + $0x100] sm:$0xff]   ;;  %v1026_v2 = vld [vmem:[%s1379_s1 + $0x148] sm:$0xff]  }
  0xae   :  { %v51_v4 = vmul.f32 %v1252_v59, %v1128_v8  ;;  %v53_v5 = vmul.f32 %v1252_v59, %v1151_v17  ;;  %v1025_v0 = vld [vmem:[%s1379_s1 + $0x180] sm:$0xff]   ;;  %v1027_v3 = vld [vmem:[%s1379_s1 + $0x1c8] sm:$0xff]   ;;  %v1031_v17 = vld [vmem:[%s1379_s1 + $0x1d0] sm:$0xff]   ;;  %v50_v40 = vmul.f32 %v1252_v59, %v1123_v7  ;;  %v52_v41 = vmul.f32 %v1252_v59, %v1138_v12 }
  0xaf   :  { %v55_v6 = vpack.c.bf16 %v47_v60, %v47_v60  ;;  %v57_v9 = vpack.c.bf16 %v49_v61, %v49_v61  ;;  %v54_v10 = vpack.c.bf16 %v46_v62, %v46_v62  ;;  %v56_v11 = vpack.c.bf16 %v48_v63, %v48_v63 }
  0xb0   :  { %v59_v8 = vpack.c.bf16 %v51_v4, %v51_v4  ;;  %v61_v13 = vpack.c.bf16 %v53_v5, %v53_v5  ;;  %v58_v42 = vpack.c.bf16 %v50_v40, %v50_v40  ;;  %v60_v43 = vpack.c.bf16 %v52_v41, %v52_v41 }
  0xb1   :  { %606 = vmatprep.mubr.bf16.mxu0 %v55_v6  ;;  %646 = vmatprep.mubr.bf16.mxu1 %v57_v9  ;;  %v736_v5 = vshrl.u32 %v735_v54, 7  ;;  %v741_v6 = vand.u32 127, %v735_v54 }
  0xb2   :  { %607 = vmatmul.mubr.bf16.vlgmr.msra.gmra.mrb[0].mxu0 %v54_v10  ;;  %647 = vmatmul.mubr.bf16.vlgmr.msra.gmra.mrb[0].mxu1 %v56_v11 }
  0xb3   :  { %938 = vmatpush3.bf16.msra.mxu0 %v1024_v1  ;;  %960 = vmatpush3.bf16.msra.mxu1 %v1025_v0  ;;  %vm742_vm1 = vcmp.eq.s32.totalorder %v736_v5, %v741_v6 }
  0xb4   :  { %686 = vmatprep.mubr.bf16.mxu0 %v59_v8  ;;  %726 = vmatprep.mubr.bf16.mxu1 %v61_v13 }
  0xb5   :  { %939 = vmatprep.subr.bf16.mxu0 %v1026_v2  ;;  %961 = vmatprep.subr.bf16.mxu1 %v1027_v3 }
  0xb7   :  { %940 = vmatpush3.bf16.msra.mxu0 %v1028_v14  ;;  %962 = vmatpush3.bf16.msra.mxu1 %v1029_v15 }
  0xb8   :  { %941 = vmatprep.subr.bf16.mxu0 %v1030_v16  ;;  %963 = vmatprep.subr.bf16.mxu1 %v1031_v17  ;;  %v748_v16 = vld [vmem:[#allocation2] sm:$0x1] }
  0xbb   :  { %942 = vmatpush3.bf16.msra.mxu0 %v1032_v18  ;;  %964 = vmatpush3.bf16.msra.mxu1 %v1033_v19 }
  0xbc   :  { %943 = vmatprep.subr.bf16.mxu0 %v1034_v20  ;;  %965 = vmatprep.subr.bf16.mxu1 %v1035_v21  ;;  %v1077_v21 = vmov 0  }
  0xbd   :  { %988 = vset.pattern.permute.xlu1 %v1077_v21  ;;  %989 = vset.pattern.permute.xlu0 %v1077_v21 }
  0xbf   :  { %944 = vmatpush3.bf16.msra.mxu0 %v1036_v22  ;;  %966 = vmatpush3.bf16.msra.mxu1 %v1037_v23 }
  0xc0   :  { %945 = vmatprep.subr.bf16.mxu0 %v1038_v24  ;;  %967 = vmatprep.subr.bf16.mxu1 %v1039_v25 }
  0xc3   :  { %946 = vmatpush3.bf16.msra.mxu0 %v1040_v26  ;;  %968 = vmatpush3.bf16.msra.mxu1 %v1041_v27 }
  0xc4   :  { %947 = vmatprep.subr.bf16.mxu0 %v1042_v28  ;;  %969 = vmatprep.subr.bf16.mxu1 %v1043_v29 }
  0xc7   :  { %948 = vmatpush3.bf16.msra.mxu0 %v1044_v30  ;;  %970 = vmatpush3.bf16.msra.mxu1 %v1045_v31  ;;  %v778_v30 = vsub.s32 0, %v736_v5 }
  0xc8   :  { %949 = vmatprep.subr.bf16.mxu0 %v1046_v32  ;;  %971 = vmatprep.subr.bf16.mxu1 %v1047_v33 }
  0xcb   :  { %950 = vmatpush3.bf16.msra.mxu0 %v1048_v34  ;;  %972 = vmatpush3.bf16.msra.mxu1 %v1049_v35 }
  0xcc   :  { %951 = vmatprep.subr.bf16.mxu0 %v1050_v36  ;;  %973 = vmatprep.subr.bf16.mxu1 %v1051_v37 }
  0xcf   :  { %952 = vmatpush3.bf16.msra.mxu0 %v1052_v38  ;;  %974 = vmatpush3.bf16.msra.mxu1 %v1053_v39 }
  0xd2   :  { %687 = vmatmul.mubr.bf16.vlgmr.msra.gmra.mrb[4].mxu0 %v58_v42  ;;  %727 = vmatmul.mubr.bf16.vlgmr.msra.gmra.mrb[4].mxu1 %v60_v43 }
 0x185   :  { %v909_v45 = vpop.f32.mrb[0].mxu0  ;;  %v931_v46 = vpop.f32.mrb[0].mxu1 }
 0x186   :  { %v910_v47 = vpop.f32.mrb[1].mxu0  ;;  %v932_v48 = vpop.f32.mrb[1].mxu1 }
 0x187   :  { %v911_v49 = vadd.f32 %v910_v47, %v909_v45  ;;  %v933_v50 = vadd.f32 %v932_v48, %v931_v46  ;;  %v912_v7 = vpop.f32.mrb[2].mxu0  ;;  %v934_v51 = vpop.f32.mrb[2].mxu1 }
 0x188   :  { %v913_v52 = vpop.f32.mrb[3].mxu0  ;;  %v935_v12 = vpop.f32.mrb[3].mxu1 }
 0x189   :  { %v649_v53 = vadd.f32 %v933_v50, %v911_v49 }
 0x1a5   :  { %v953_v55 = vpop.f32.mrb[4].mxu0  ;;  %v975_v56 = vpop.f32.mrb[4].mxu1 }
 0x1a6   :  { %v954_v57 = vpop.f32.mrb[5].mxu0  ;;  %v976_v58 = vpop.f32.mrb[5].mxu1 }
 0x1a7   :  { %v955_v59 = vadd.f32 %v954_v57, %v953_v55  ;;  %v977_v60 = vadd.f32 %v976_v58, %v975_v56  ;;  %v956_v61 = vpop.f32.mrb[6].mxu0  ;;  %v978_v62 = vpop.f32.mrb[6].mxu1 }
 0x1a8   :  { %v957_v63 = vpop.f32.mrb[7].mxu0  ;;  %v979_v4 = vpop.f32.mrb[7].mxu1 }
 0x1a9   :  { %v689_v9 = vadd.f32 %v955_v59, %v649_v53 }
 0x1ab   :  { %v729_v10 = vadd.f32 %v977_v60, %v689_v9 }
 0x1ad   :  { %v734_v11 = vmul.f32 2.0, %v729_v10 }
 0x1af   :  { %v758_v1 = vmul.f32 1.442695, %v734_v11  ;;  %v743_v0 = vsel %vm742_vm1, %v734_v11, 0.0 }
 0x1b0   :  { %v745_v2 = vsel %vm744_vm2, %v743_v0, 0.0 }
 0x1b1   :  { %1056 = vpow2.f32 %v758_v1  ;;  %746 = vadd.xlane.f32.xlu0 %v745_v2  ;;  %v749_v3 = vrot.slane %v745_v2, 4 }
 0x1b3   :  { %v750_v8 = vadd.f32 %v749_v3, %v745_v2 }
 0x1b5   :  { %v751_v13 = vrot.slane %v750_v8, 2 }
 0x1b7   :  { %v752_v14 = vadd.f32 %v751_v13, %v750_v8 }
 0x1b9   :  { %v753_v15 = vrot.slane %v752_v14, 1 }
 0x1bb   :  { %v1057_v17 = vpop.eup %1056  ;;  %v754_v18 = vadd.f32 %v753_v15, %v752_v14 }
 0x1bc   :  { %v760_v19 = vsel %vm744_vm2, %v1057_v17, 0.0 }
 0x1bd   :  { %v755_v20 = vadd.f32 %v754_v18, %v748_v16  ;;  %761 = vadd.xlane.f32.xlu1 %v760_v19 }
 0x1bf   :  { %757 = vst.msk [vmem:[#allocation2] sm:$0x1] %vm17_vm0, %v755_v20 }
 0x1c6   :  { %v771_v28 = vld [vmem:[#allocation2] sm:$0x1] }
 0x1c7   :  { %v772_v29 = vmul.f32 1.442695, %v771_v28  ;;  %v799_v38 = vsel %vm17_vm0, %v771_v28, 0.0 }
 0x23e   :  { %v747_v22 = vpop.xlane.xlu0 %746 }
 0x23f   :  { %v763_v23 = vmul.f32 1.442695, %v747_v22 }
 0x241   :  { %1058 = vpow2.f32 %v763_v23 }
 0x242   :  { %1060 = vpow2.f32 %v772_v29 }
 0x24a   :  { %v762_v24 = vpop.xlane.xlu1 %761 }
 0x24b   :  { %v1059_v25 = vpop.eup %1058 }
 0x24c   :  { %v765_v26 = vsub.f32 %v762_v24, %v1059_v25  ;;  %v1061_v31 = vpop.eup %1060 }
 0x24d   :  { %v779_v32 = vrot.slane %v1061_v31, %v778_v30 }
 0x24e   :  { %767 = vst.msk [vmem:[#allocation3] sm:$0xff] %vm766_vm3, %v765_v26 }
 0x255   :  { %v774_v27 = vld [vmem:[#allocation3] sm:$0xff] }
 0x256   :  { %783 = vperm.xlu1 %988, %v774_v27  }
 0x2d5   :  { %v784_v33 = vpop.permute.xlu1 %783 }
 0x2d6   :  { %v786_v34 = vadd.f32 %v784_v33, %v779_v32 }
 0x2d8   :  { %1062 = vlog2.f32 %v786_v34 }
 0x2e2   :  { %v1063_v35 = vpop.eup %1062 }
 0x2e3   :  { %v788_v36 = vmul.f32 0.6931472, %v1063_v35 }
 0x2e5   :  { %v789_v37 = vsel %vm744_vm2, %v788_v36, 0.0 }
 0x2e6   :  { %790 = vadd.xlane.f32.xlu0 %v789_v37 }
 0x2ea   :  { %800 = vadd.xlane.f32.xlu0 %v799_v38 }
 0x373   :  { %v791_v39 = vpop.xlane.xlu0 %790 }
 0x374   :  { %v792_v40 = vrot.slane %v791_v39, 4 }
 0x376   :  { %v793_v41 = vadd.f32 %v792_v40, %v791_v39 }
 0x377   :  { %v801_v42 = vpop.xlane.xlu0 %800 }
 0x378   :  { %v794_v43 = vrot.slane %v793_v41, 2  ;;  %v802_v44 = vrot.slane %v801_v42, 4 }
 0x37a   :  { %v803_v45 = vadd.f32 %v802_v44, %v801_v42  ;;  %v795_v46 = vadd.f32 %v794_v43, %v793_v41 }
 0x37c   :  { %v804_v47 = vrot.slane %v803_v45, 2  ;;  %v796_v48 = vrot.slane %v795_v46, 1 }
 0x37e   :  { %v805_v49 = vadd.f32 %v804_v47, %v803_v45  ;;  %v797_v50 = vadd.f32 %v796_v48, %v795_v46 }
 0x380   :  { %981 = vpush %v797_v50  ;;  %v806_v7 = vrot.slane %v805_v49, 1 }
 0x382   :  { %v807_v51 = vadd.f32 %v806_v7, %v805_v49 }
 0x384   :  { %983 = vpush %v807_v51 }
 0x3b1   :  { %s982_s1 = spop %981 }
 0x3b5   :  { %s984_s0 = spop %983 }
 0x3b6   :  { %s809_s9 = smul.f32 8.0, %s984_s0 }
 0x3b8   :  { %s810_s10 = ssub.f32 %s982_s1, %s809_s9 }
 0x3ba   :  { %s813_s11 = smul.f32 0.125, %s810_s10 }
 0x3bc   :  { %815 = sst [smem:[#allocation4]] %s813_s11 }
 0x3bd   :  { %1073 = shalt.err (!%p1070_p2)
}
 0x3be   :  { %s1078_s19 = smov [#allocation4]  }
 0x3bf   :  { %823 = dma.smem_to_hbm %s1078_s19, 16, %s1380_s2, [#allocation5]  }
 0x3c0   :  { %1074 = dma.done.wait [#allocation5], 16  }
 0x3c1   :  { %1075 = vsyncadd [#allocation5], 4294967280 }
 0x3c2   :  { %827 = sfence }
 0x3c3   :  { %828 = vsyncpa [#allocation5], 1 }

</bundles_post_ra>
